<compile_context>
chip_gen: v5e
topology: v5e:2x2
jax: 0.10.0
libtpu: 0.0.40
codegen_flags: <defaults>
</compile_context>

<pallas_src>
import functools

import jax
import jax.numpy as jnp
from jax import lax
from jax.experimental import pallas as pl
from jax.experimental.pallas import tpu as pltpu


def _round_up(x, m):
    return (x + m - 1) // m * m


def _apply_scale_norm(rows, scale, l2norm_embed, out_dtype):
    """scale + optional F.normalize(p=2, dim=-1, eps=1e-12) on a (R, dim) tile."""
    rows = rows.astype(jnp.float32) * scale
    if l2norm_embed:
        sumsq = jnp.sum(rows * rows, axis=-1, keepdims=True)
        # x / max(||x||, eps)  ==  x * rsqrt(max(||x||^2, eps^2)); rsqrt -> EUP.
        inv = lax.rsqrt(jnp.maximum(sumsq, 1e-24))
        rows = rows * inv
    return rows.astype(out_dtype)


# ---------------------------------------------------------------------------
# Path 1: contiguous (pos == arange(seq_len)) — dense tiled copy + scale/norm.
# ---------------------------------------------------------------------------
def _contiguous_kernel(emb_ref, out_ref, *, scale, l2norm_embed):
    out_ref[...] = _apply_scale_norm(
        emb_ref[...], scale, l2norm_embed, out_ref.dtype)


def _abs_pos_emb_contiguous(emb_weight, seq_len, *, scale, l2norm_embed):
    max_seq_len, dim = emb_weight.shape

    # Biggest sublane-dense row tile that keeps VMEM use modest
    # (<= ~2 MiB/tile -> <= ~8 MiB with double buffering, safe on all gens).
    bytes_per_row = dim * 4
    tm_cap = max(8, ((2 * 1024 * 1024) // bytes_per_row) // 8 * 8)
    tm = min(512, tm_cap, _round_up(seq_len, 8))
    grid = (pl.cdiv(seq_len, tm),)

    kernel = functools.partial(
        _contiguous_kernel, scale=scale, l2norm_embed=l2norm_embed)

    return pl.pallas_call(
        kernel,
        out_shape=jax.ShapeDtypeStruct((seq_len, dim), emb_weight.dtype),
        grid=grid,
        in_specs=[pl.BlockSpec((tm, dim), lambda i: (i, 0))],
        out_specs=pl.BlockSpec((tm, dim), lambda i: (i, 0)),
        compiler_params=pltpu.CompilerParams(
            dimension_semantics=("parallel",)),   # v7x: shard across both TCs
    )(emb_weight)


# ---------------------------------------------------------------------------
# Path 2: data-dependent gather — TG rows per grid step via per-row DMAs.
# ---------------------------------------------------------------------------
def _gather_kernel(pos_ref, emb_hbm, out_ref, rows_vmem, sems, *,
                   tg, scale, l2norm_embed):
    i = pl.program_id(0)
    # Issue TG concurrent per-row gather DMAs (row indices from SMEM pos).
    copies = []
    for r in range(tg):
        idx = pos_ref[i * tg + r]
        cp = pltpu.make_async_copy(
            emb_hbm.at[pl.ds(idx, 1), :],      # (1, dim) HBM row slice
            rows_vmem.at[pl.ds(r, 1), :],      # (1, dim) VMEM dst row
            sems.at[r])
        cp.start()
        copies.append(cp)
    for cp in copies:
        cp.wait()
    out_ref[...] = _apply_scale_norm(
        rows_vmem[...], scale, l2norm_embed, out_ref.dtype)


def _abs_pos_emb_gather(emb_weight, pos, *, scale, l2norm_embed):
    max_seq_len, dim = emb_weight.shape
    seq_len = pos.shape[0]

    tg = min(16, _round_up(seq_len, 8))          # >=8 rows/step, sublane-dense
    n_tiles = pl.cdiv(seq_len, tg)

    # Clamp indices (nn.Embedding would raise on OOB; clamping keeps the
    # data-dependent DMA well-defined) and pad pos to a whole number of tiles.
    pos = jnp.clip(pos.astype(jnp.int32), 0, max_seq_len - 1)
    pad = n_tiles * tg - seq_len
    if pad:
        pos = jnp.pad(pos, (0, pad))

    kernel = functools.partial(
        _gather_kernel, tg=tg, scale=scale, l2norm_embed=l2norm_embed)

    grid_spec = pltpu.PrefetchScalarGridSpec(
        num_scalar_prefetch=1,                    # pos lands in SMEM
        grid=(n_tiles,),
        in_specs=[pl.BlockSpec(memory_space=pl.ANY)],   # table stays in HBM
        out_specs=pl.BlockSpec((tg, dim), lambda i, pos_ref: (i, 0)),
        scratch_shapes=[
            pltpu.VMEM((tg, dim), emb_weight.dtype),
            pltpu.SemaphoreType.DMA((tg,)),
        ],
    )

    return pl.pallas_call(
        kernel,
        out_shape=jax.ShapeDtypeStruct((seq_len, dim), emb_weight.dtype),
        grid_spec=grid_spec,
        compiler_params=pltpu.CompilerParams(
            dimension_semantics=("parallel",)),   # independent output tiles
    )(pos, emb_weight)


# ---------------------------------------------------------------------------
# Module wrapper mirroring the PyTorch __init__/forward.
# ---------------------------------------------------------------------------
class AbsolutePositionalEmbeddingJAX:

    def __init__(self, dim, max_seq_len, l2norm_embed=False, *, key):
        self.scale = dim ** (-0.5) if not l2norm_embed else 1.0
        self.max_seq_len = max_seq_len
        self.l2norm_embed = l2norm_embed
        # nn.Embedding default init: N(0, 1)
        self.emb_weight = jax.random.normal(key, (max_seq_len, dim), jnp.float32)

    def __call__(self, x, pos=None):
        seq_len = x.shape[1]
        assert seq_len <= self.max_seq_len, (
            f"sequence length {seq_len} exceeds max {self.max_seq_len}")

        # Dominant case: pos=None -> arange -> pure contiguous slice, no gather.
        if pos is None:
            return _abs_pos_emb_contiguous(
                self.emb_weight, seq_len,
                scale=self.scale, l2norm_embed=self.l2norm_embed)

        return _abs_pos_emb_gather(
            self.emb_weight, pos,
            scale=self.scale, l2norm_embed=self.l2norm_embed)


if __name__ == "__main__":
    key = jax.random.PRNGKey(0)
    k1, k2, kx = jax.random.split(key, 3)

    batch, seq_len, dim, max_seq_len = 2, 40, 128, 96
    x = jax.random.normal(kx, (batch, seq_len, dim), jnp.float32)

    # --- contiguous fast path (pos=None), no l2norm ---
    mod = AbsolutePositionalEmbeddingJAX(dim, max_seq_len, l2norm_embed=False, key=k1)
    out = jax.block_until_ready(mod(x))
    ref = mod.emb_weight[:seq_len] * mod.scale
    assert out.shape == (seq_len, dim)
    assert jnp.allclose(out, ref, atol=1e-5, rtol=1e-5), "contiguous path mismatch"

    # --- data-dependent gather path, with l2norm ---
    mod2 = AbsolutePositionalEmbeddingJAX(dim, max_seq_len, l2norm_embed=True, key=k2)
    pos = ((jnp.arange(seq_len) * 7 + 3) % max_seq_len).astype(jnp.int32)
    out2 = jax.block_until_ready(mod2(x, pos))
    e = mod2.emb_weight[pos] * mod2.scale
    ref2 = e / jnp.maximum(jnp.linalg.norm(e, axis=-1, keepdims=True), 1e-12)
    assert out2.shape == (seq_len, dim)
    assert jnp.allclose(out2, ref2, atol=1e-5, rtol=1e-5), "gather path mismatch"

    print("KERNEL_OK")
</pallas_src>

<mosaic_0001>
module attributes {stable_mosaic.version = 11 : i64} {
  func.func @_contiguous_kernel(%arg0: i32, %arg1: memref<40x128xf32, #tpu.memory_space<vmem>>, %arg2: memref<40x128xf32, #tpu.memory_space<vmem>>) attributes {dimension_semantics = [#tpu.dimension_semantics<parallel>], iteration_bounds = array<i64: 1>, scalar_prefetch = 0 : i64, scratch_operands = 0 : i64, tpu.core_type = #tpu.core_type<tc>, window_params = [{transform_indices = @transform_0, window_bounds = array<i64: 40, 128>}, {transform_indices = @transform_1, window_bounds = array<i64: 40, 128>}]} {
    %c0 = arith.constant 0 : index
    %c0_0 = arith.constant 0 : index
    %0 = vector.load %arg1[%c0, %c0_0] : memref<40x128xf32, #tpu.memory_space<vmem>>, vector<40x128xf32>
    %cst = arith.constant 0.0883883461 : f32
    %1 = vector.broadcast %cst : f32 to vector<40x128xf32>
    %2 = arith.mulf %0, %1 : vector<40x128xf32>
    %c0_1 = arith.constant 0 : index
    %c0_2 = arith.constant 0 : index
    %3 = vector.load %arg2[%c0_1, %c0_2] : memref<40x128xf32, #tpu.memory_space<vmem>>, vector<40x128xf32>
    tpu.vector_store %arg2[%c0_1, %c0_2], %2 {strides = array<i32>} : memref<40x128xf32, #tpu.memory_space<vmem>>, vector<40x128xf32>,
    return
  }
  func.func @transform_0(%arg0: i32) -> (i32, i32) {
    %c0_i32 = arith.constant 0 : i32
    %c0_i32_0 = arith.constant 0 : i32
    return %arg0, %c0_i32 : i32, i32
  }
  func.func @transform_1(%arg0: i32) -> (i32, i32) {
    %c0_i32 = arith.constant 0 : i32
    %c0_i32_0 = arith.constant 0 : i32
    return %arg0, %c0_i32 : i32, i32
  }
}

</mosaic_0001>

<bundles_post_ra>
// kernel: tpu_custom_call.1
= control target key start
LH: loop header
LB: loop body
LE: loop exit
PB: predicated region body
PF: predicated region fallthrough
CT: control target
= control target key end

     0   :  { %6 = vsyncpa [#allocation3], 0  ;;  %s135_s0 = inlined_call_operand.hbm [shape: f32[96,128], index: 0, kind: input, shape index: {}]   ;;  %s136_s1 = inlined_call_operand.hbm [shape: f32[40,128], index: 1, kind: output, shape index: {}]  }
   0x1   :  { %7 = vsyncpa [#allocation4], 0  ;;  %s12_s8 = sshll.u32 %s135_s0, 4  ;;  %s115_s9 = smov [#allocation2]   ;;  %s13_s8 = int_to_ptr.hbm [resolvable:$true] %s12_s8 }
   0x2   :  { %s14_s10 = sshll.u32 %s115_s9, 4  ;;  %s116_s11 = smov 128   ;;  %s15_s10 = int_to_ptr.vmem [resolvable:$true] %s14_s10 }
   0x3   :  { %s117_s12 = smov 8  }
   0x4   :  { %20 = dma.hbm_to_vmem [thread:$0]  %s13_s8, 640, %s15_s10, [#allocation3], %s116_s11, %s116_s11, %s117_s12  }
   0x5   :  { %111 = dma.done.wait [#allocation3], 640  }
   0x6   :  { %112 = vsyncadd [#allocation3], 4294966656  ;;  %v25_v0 = vld [vmem:[#allocation2] sm:$0xff]  ;;  %v26_v1 = vld [vmem:[#allocation2 + $0x8] sm:$0xff]  ;;  %s118_s13 = smov [#allocation5]   ;;  %s46_s16 = sshll.u32 %s136_s1, 4  ;;  %s47_s16 = int_to_ptr.hbm [resolvable:$true] %s46_s16 }
   0x7   :  { %v27_v2 = vld [vmem:[#allocation2 + $0x10] sm:$0xff]  ;;  %v30_v3 = vmul.f32 0.088388346, %v25_v0  ;;  %v31_v4 = vmul.f32 0.088388346, %v26_v1  ;;  %v28_v6 = vld [vmem:[#allocation2 + $0x18] sm:$0xff] }
   0x8   :  { %v32_v5 = vmul.f32 0.088388346, %v27_v2  ;;  %v29_v7 = vld [vmem:[#allocation2 + $0x20] sm:$0xff]  ;;  %s44_s14 = sshll.u32 %s118_s13, 4  ;;  %v33_v8 = vmul.f32 0.088388346, %v28_v6  ;;  %s45_s14 = int_to_ptr.vmem [resolvable:$true] %s44_s14 }
   0x9   :  { %35 = vst [vmem:[#allocation5] sm:$0xff] %v30_v3  ;;  %v34_v9 = vmul.f32 0.088388346, %v29_v7 }
   0xa   :  { %36 = vst [vmem:[#allocation5 + $0x8] sm:$0xff] %v31_v4 }
   0xb   :  { %37 = vst [vmem:[#allocation5 + $0x10] sm:$0xff] %v32_v5 }
   0xc   :  { %38 = vst [vmem:[#allocation5 + $0x18] sm:$0xff] %v33_v8 }
   0xd   :  { %39 = vst [vmem:[#allocation5 + $0x20] sm:$0xff] %v34_v9 }
   0xe   :  { %52 = dma.vmem_to_hbm [thread:$0]  %s45_s14, 640, %s47_s16, [#allocation4], %s116_s11, %s116_s11, %s117_s12  }
   0xf   :  { %113 = dma.done.wait [#allocation4], 640  }
  0x10   :  { %114 = vsyncadd [#allocation4], 4294966656 }
  0x11   :  { %57 = vsyncpa [#allocation3], 1 }
  0x12   :  { %58 = vsyncpa [#allocation4], 1 }

</bundles_post_ra>
